<compile_context>
chip_gen: v6e
topology: v6e:2x2x1
jax: 0.10.0
libtpu: 0.0.40
codegen_flags: <defaults>
</compile_context>

<pallas_src>
import jax
import jax.numpy as jnp
from jax import lax
from jax.experimental import pallas as pl
from jax.experimental.pallas import tpu as pltpu

BN_EPS = 1e-5
LANE = 128


def _round_up(n, m=LANE):
    return ((n + m - 1) // m) * m


# ------------------------------ fused kernel ---------------------------------

def _make_fused_kernel(n_hidden, pad_offsets, pad_widths):
    """Build the fused forward kernel for a fixed (static) layer structure.

    Ref order (inputs then outputs):
      x,
      (w_i [bf16, in_p x out_p], packed_i [f32, 3 x out_p]) for each hidden layer,
      w_out [bf16], b_out [f32, 1 x out_p],
      s_slab_out [B, sum(pad_widths)], out_pad [B, round_up(in_features)]
    All feature axes are zero-padded to multiples of 128; slab offsets/widths
    are multiples of 128 so every store is lane-dense.
    """

    def kernel(*refs):
        x_ref = refs[0]
        layer_refs = refs[1:1 + 2 * n_hidden]
        w_out_ref = refs[1 + 2 * n_hidden]
        b_out_ref = refs[2 + 2 * n_hidden]
        s_ref = refs[3 + 2 * n_hidden]
        o_ref = refs[4 + 2 * n_hidden]

        a = x_ref[...]                        # f32 activation
        inv_b = 1.0 / a.shape[0]

        for i in range(n_hidden):             # static loop -> unrolled at trace
            w = layer_refs[2 * i][...]        # bf16 (in_p, out_p)
            pk = layer_refs[2 * i + 1][...]   # f32  (3, out_p): bias/gamma/beta
            bias, gamma, beta = pk[0:1], pk[1:2], pk[2:3]

            # Linear: bf16 MXU inputs, f32 accumulation.
            wa = jnp.dot(a.astype(jnp.bfloat16), w,
                         preferred_element_type=jnp.float32) + bias

            # BatchNorm1d (training mode): two-pass (shifted) mean/variance,
            # then per-feature scale/shift so the (B,N) work is 2 ops/elem.
            mean = jnp.sum(wa, axis=0, keepdims=True) * inv_b
            centered = wa - mean
            var = jnp.sum(centered * centered, axis=0, keepdims=True) * inv_b
            scale = gamma * lax.rsqrt(var + BN_EPS)
            s = centered * scale + beta       # padded cols stay exactly 0

            # Lane-dense store of the full padded-width S at a 128-aligned
            # offset: the "concat" happens right here, in VMEM, unmasked.
            off, dp = pad_offsets[i], pad_widths[i]
            s_ref[:, off:off + dp] = s

            a = jnp.maximum(s, 0.0)           # ReLU (padded cols stay 0)

        # Output layer: Linear + exact sigmoid via one tanh (single EUP op).
        wa = jnp.dot(a.astype(jnp.bfloat16), w_out_ref[...],
                     preferred_element_type=jnp.float32) + b_out_ref[...]
        o_ref[...] = 0.5 * jnp.tanh(0.5 * wa) + 0.5

    return kernel


# ------------------------------ forward builder -------------------------------

def build_forward(in_features, hidden_sizes):
    """Returns a jitted forward(x, hidden_params, out_params) ->
    (hidden_activations [B, sum(hidden_sizes)], output [B, in_features])."""
    hidden_sizes = tuple(int(h) for h in hidden_sizes)
    n_hidden = len(hidden_sizes)
    pad_widths = tuple(_round_up(h) for h in hidden_sizes)
    pad_offsets = []
    acc = 0
    for pw in pad_widths:
        pad_offsets.append(acc)
        acc += pw
    pad_offsets = tuple(pad_offsets)
    slab_pad = sum(pad_widths)
    out_pad = _round_up(in_features)

    kernel = _make_fused_kernel(n_hidden, pad_offsets, pad_widths)

    def forward(x, hidden_params, out_params):
        B = x.shape[0]
        flat_inputs = [x]
        for (w, packed) in hidden_params:
            flat_inputs += [w, packed]
        w_out, b_out = out_params
        flat_inputs += [w_out, b_out]

        full = lambda shp: pl.BlockSpec(shp, lambda: (0,) * len(shp))
        in_specs = [full(a.shape) for a in flat_inputs]

        # Advisory cost estimate for the XLA scheduler.
        k_dims = [x.shape[1]] + list(pad_widths)       # matmul K per layer
        n_dims = list(pad_widths) + [out_pad]          # matmul N per layer
        flops = 2 * B * sum(k * n for k, n in zip(k_dims, n_dims))
        transcendentals = B * out_pad + slab_pad       # tanh + per-feature rsqrt
        bytes_accessed = (sum(a.size * a.dtype.itemsize for a in flat_inputs)
                          + 4 * B * (slab_pad + out_pad))

        s_slab, o_padded = pl.pallas_call(
            kernel,
            out_shape=(jax.ShapeDtypeStruct((B, slab_pad), jnp.float32),
                       jax.ShapeDtypeStruct((B, out_pad), jnp.float32)),
            in_specs=in_specs,
            out_specs=(full((B, slab_pad)), full((B, out_pad))),
            compiler_params=pltpu.CompilerParams(
                vmem_limit_bytes=64 * 1024 * 1024),
            cost_estimate=pl.CostEstimate(
                flops=int(flops),
                transcendentals=int(transcendentals),
                bytes_accessed=int(bytes_accessed)),
        )(*flat_inputs)

        # De-pad: pull each layer's true-width S columns out of the padded slab.
        hidden_acts = jnp.concatenate(
            [s_slab[:, off:off + d]
             for off, d in zip(pad_offsets, hidden_sizes)], axis=1)
        return hidden_acts, o_padded[:, :in_features]

    return jax.jit(forward)


# --------------------------- parameter init (padded) --------------------------

def init_params(key, in_features, hidden_sizes):
    """PyTorch-style init: Linear W,b ~ U(-1/sqrt(fan_in), +), BN gamma=1, beta=0.

    Weights are stored transposed vs PyTorch ([in, out]), zero-padded so every
    feature axis is a multiple of 128, and cast to bf16 (MXU fast path; f32
    accumulation in-kernel). bias/gamma/beta are packed into one (3, out_p)
    f32 operand per layer. Zero padding does not change forward values."""
    sizes = [in_features] + list(hidden_sizes)
    hidden_params = []
    for i in range(len(hidden_sizes)):
        key, k_w, k_b = jax.random.split(key, 3)
        fan_in, fan_out = sizes[i], sizes[i + 1]
        bound = 1.0 / float(fan_in) ** 0.5
        in_p = in_features if i == 0 else _round_up(fan_in)
        out_p = _round_up(fan_out)

        w = jax.random.uniform(k_w, (fan_in, fan_out), jnp.float32, -bound, bound)
        w = jnp.pad(w, ((0, in_p - fan_in), (0, out_p - fan_out)))
        w = w.astype(jnp.bfloat16)

        b = jax.random.uniform(k_b, (fan_out,), jnp.float32, -bound, bound)
        packed = jnp.zeros((3, out_p), jnp.float32)
        packed = packed.at[0, :fan_out].set(b)     # bias
        packed = packed.at[1, :fan_out].set(1.0)   # gamma (padded cols stay 0)
        # row 2: beta = 0 everywhere
        hidden_params.append((w, packed))

    key, k_w, k_b = jax.random.split(key, 3)
    fan_in = sizes[-1]
    bound = 1.0 / float(fan_in) ** 0.5
    in_p = _round_up(fan_in)
    out_p = _round_up(in_features)
    w_out = jax.random.uniform(k_w, (fan_in, in_features), jnp.float32,
                               -bound, bound)
    w_out = jnp.pad(w_out, ((0, in_p - fan_in), (0, out_p - in_features)))
    w_out = w_out.astype(jnp.bfloat16)
    b_out = jax.random.uniform(k_b, (1, in_features), jnp.float32, -bound, bound)
    b_out = jnp.pad(b_out, ((0, 0), (0, out_p - in_features)))
    return hidden_params, (w_out, b_out)


# -------------------------------- main ---------------------------------------

if __name__ == "__main__":
    B = 8
    in_features = 32
    hidden_sizes = (64, 32)

    key = jax.random.PRNGKey(0)
    key, k_x, k_p = jax.random.split(key, 3)

    x = jax.random.normal(k_x, (B, in_features), jnp.float32)
    hidden_params, out_params = init_params(k_p, in_features, hidden_sizes)

    forward = build_forward(in_features, hidden_sizes)
    hidden_acts, output = forward(x, hidden_params, out_params)
    jax.block_until_ready((hidden_acts, output))

    assert hidden_acts.shape == (B, sum(hidden_sizes))
    assert output.shape == (B, in_features)
    assert bool(jnp.all(jnp.isfinite(hidden_acts)))
    assert bool(jnp.all((output >= 0.0) & (output <= 1.0)))
    print("KERNEL_OK")
</pallas_src>

<mosaic_0001>
module attributes {stable_mosaic.version = 11 : i64} {
  func.func @kernel(%arg0: memref<8x32xf32, #tpu.memory_space<vmem>>, %arg1: memref<32x128xbf16, #tpu.memory_space<vmem>>, %arg2: memref<3x128xf32, #tpu.memory_space<vmem>>, %arg3: memref<128x128xbf16, #tpu.memory_space<vmem>>, %arg4: memref<3x128xf32, #tpu.memory_space<vmem>>, %arg5: memref<128x128xbf16, #tpu.memory_space<vmem>>, %arg6: memref<1x128xf32, #tpu.memory_space<vmem>>, %arg7: memref<8x256xf32, #tpu.memory_space<vmem>>, %arg8: memref<8x128xf32, #tpu.memory_space<vmem>>) attributes {dimension_semantics = [], scalar_prefetch = 0 : i64, scratch_operands = 0 : i64, tpu.core_type = #tpu.core_type<tc>} {
    %c0 = arith.constant 0 : index
    %c0_0 = arith.constant 0 : index
    %0 = vector.load %arg0[%c0, %c0_0] : memref<8x32xf32, #tpu.memory_space<vmem>>, vector<8x32xf32>
    %c0_1 = arith.constant 0 : index
    %c0_2 = arith.constant 0 : index
    %1 = vector.load %arg1[%c0_1, %c0_2] : memref<32x128xbf16, #tpu.memory_space<vmem>>, vector<32x128xbf16>
    %c0_3 = arith.constant 0 : index
    %c0_4 = arith.constant 0 : index
    %2 = vector.load %arg2[%c0_3, %c0_4] : memref<3x128xf32, #tpu.memory_space<vmem>>, vector<3x128xf32>
    %3 = vector.extract_strided_slice %2 {offsets = [0, 0], sizes = [1, 128], strides = [1, 1]} : vector<3x128xf32> to vector<1x128xf32>
    %4 = vector.extract_strided_slice %2 {offsets = [1, 0], sizes = [1, 128], strides = [1, 1]} : vector<3x128xf32> to vector<1x128xf32>
    %5 = vector.extract_strided_slice %2 {offsets = [2, 0], sizes = [1, 128], strides = [1, 1]} : vector<3x128xf32> to vector<1x128xf32>
    %6 = arith.truncf %0 : vector<8x32xf32> to vector<8x32xbf16>
    %cst = arith.constant dense<0.000000e+00> : vector<8x128xf32>
    %7 = tpu.matmul %6, %1, %cst {dimension_numbers = #tpu.dot_dimension_numbers<[1], [0], [0], [1], [0, 0, 1, 1], [], []>} : vector<8x32xbf16>, vector<32x128xbf16>, vector<8x128xf32> -> vector<8x128xf32>
    %8 = vector.broadcast %3 : vector<1x128xf32> to vector<8x128xf32>
    %9 = arith.addf %7, %8 : vector<8x128xf32>
    %cst_5 = arith.constant dense<0.000000e+00> : vector<128xf32>
    %10 = vector.multi_reduction <add>, %9, %cst_5 [0] : vector<8x128xf32> to vector<128xf32>
    %11 = vector.shape_cast %10 : vector<128xf32> to vector<1x128xf32>
    %cst_6 = arith.constant 1.250000e-01 : f32
    %12 = vector.broadcast %cst_6 : f32 to vector<1x128xf32>
    %13 = arith.mulf %11, %12 : vector<1x128xf32>
    %14 = vector.broadcast %13 : vector<1x128xf32> to vector<8x128xf32>
    %15 = arith.subf %9, %14 : vector<8x128xf32>
    %16 = arith.mulf %15, %15 : vector<8x128xf32>
    %cst_7 = arith.constant dense<0.000000e+00> : vector<128xf32>
    %17 = vector.multi_reduction <add>, %16, %cst_7 [0] : vector<8x128xf32> to vector<128xf32>
    %18 = vector.shape_cast %17 : vector<128xf32> to vector<1x128xf32>
    %cst_8 = arith.constant 1.250000e-01 : f32
    %19 = vector.broadcast %cst_8 : f32 to vector<1x128xf32>
    %20 = arith.mulf %18, %19 : vector<1x128xf32>
    %cst_9 = arith.constant 9.99999974E-6 : f32
    %21 = vector.broadcast %cst_9 : f32 to vector<1x128xf32>
    %22 = arith.addf %20, %21 : vector<1x128xf32>
    %23 = math.rsqrt %22 : vector<1x128xf32>
    %24 = arith.mulf %4, %23 : vector<1x128xf32>
    %25 = vector.broadcast %24 : vector<1x128xf32> to vector<8x128xf32>
    %26 = arith.mulf %15, %25 : vector<8x128xf32>
    %27 = vector.broadcast %5 : vector<1x128xf32> to vector<8x128xf32>
    %28 = arith.addf %26, %27 : vector<8x128xf32>
    %c0_10 = arith.constant 0 : index
    %c0_11 = arith.constant 0 : index
    %29 = vector.load %arg7[%c0_10, %c0_11] : memref<8x256xf32, #tpu.memory_space<vmem>>, vector<8x128xf32>
    tpu.vector_store %arg7[%c0_10, %c0_11], %28 {strides = array<i32>} : memref<8x256xf32, #tpu.memory_space<vmem>>, vector<8x128xf32>,
    %cst_12 = arith.constant 0.000000e+00 : f32
    %30 = vector.broadcast %cst_12 : f32 to vector<8x128xf32>
    %31 = arith.maximumf %28, %30 : vector<8x128xf32>
    %c0_13 = arith.constant 0 : index
    %c0_14 = arith.constant 0 : index
    %32 = vector.load %arg3[%c0_13, %c0_14] : memref<128x128xbf16, #tpu.memory_space<vmem>>, vector<128x128xbf16>
    %c0_15 = arith.constant 0 : index
    %c0_16 = arith.constant 0 : index
    %33 = vector.load %arg4[%c0_15, %c0_16] : memref<3x128xf32, #tpu.memory_space<vmem>>, vector<3x128xf32>
    %34 = vector.extract_strided_slice %33 {offsets = [0, 0], sizes = [1, 128], strides = [1, 1]} : vector<3x128xf32> to vector<1x128xf32>
    %35 = vector.extract_strided_slice %33 {offsets = [1, 0], sizes = [1, 128], strides = [1, 1]} : vector<3x128xf32> to vector<1x128xf32>
    %36 = vector.extract_strided_slice %33 {offsets = [2, 0], sizes = [1, 128], strides = [1, 1]} : vector<3x128xf32> to vector<1x128xf32>
    %37 = arith.truncf %31 : vector<8x128xf32> to vector<8x128xbf16>
    %cst_17 = arith.constant dense<0.000000e+00> : vector<8x128xf32>
    %38 = tpu.matmul %37, %32, %cst_17 {dimension_numbers = #tpu.dot_dimension_numbers<[1], [0], [0], [1], [0, 0, 1, 1], [], []>} : vector<8x128xbf16>, vector<128x128xbf16>, vector<8x128xf32> -> vector<8x128xf32>
    %39 = vector.broadcast %34 : vector<1x128xf32> to vector<8x128xf32>
    %40 = arith.addf %38, %39 : vector<8x128xf32>
    %cst_18 = arith.constant dense<0.000000e+00> : vector<128xf32>
    %41 = vector.multi_reduction <add>, %40, %cst_18 [0] : vector<8x128xf32> to vector<128xf32>
    %42 = vector.shape_cast %41 : vector<128xf32> to vector<1x128xf32>
    %cst_19 = arith.constant 1.250000e-01 : f32
    %43 = vector.broadcast %cst_19 : f32 to vector<1x128xf32>
    %44 = arith.mulf %42, %43 : vector<1x128xf32>
    %45 = vector.broadcast %44 : vector<1x128xf32> to vector<8x128xf32>
    %46 = arith.subf %40, %45 : vector<8x128xf32>
    %47 = arith.mulf %46, %46 : vector<8x128xf32>
    %cst_20 = arith.constant dense<0.000000e+00> : vector<128xf32>
    %48 = vector.multi_reduction <add>, %47, %cst_20 [0] : vector<8x128xf32> to vector<128xf32>
    %49 = vector.shape_cast %48 : vector<128xf32> to vector<1x128xf32>
    %cst_21 = arith.constant 1.250000e-01 : f32
    %50 = vector.broadcast %cst_21 : f32 to vector<1x128xf32>
    %51 = arith.mulf %49, %50 : vector<1x128xf32>
    %cst_22 = arith.constant 9.99999974E-6 : f32
    %52 = vector.broadcast %cst_22 : f32 to vector<1x128xf32>
    %53 = arith.addf %51, %52 : vector<1x128xf32>
    %54 = math.rsqrt %53 : vector<1x128xf32>
    %55 = arith.mulf %35, %54 : vector<1x128xf32>
    %56 = vector.broadcast %55 : vector<1x128xf32> to vector<8x128xf32>
    %57 = arith.mulf %46, %56 : vector<8x128xf32>
    %58 = vector.broadcast %36 : vector<1x128xf32> to vector<8x128xf32>
    %59 = arith.addf %57, %58 : vector<8x128xf32>
    %c0_23 = arith.constant 0 : index
    %c128 = arith.constant 128 : index
    %60 = vector.load %arg7[%c0_23, %c128] : memref<8x256xf32, #tpu.memory_space<vmem>>, vector<8x128xf32>
    tpu.vector_store %arg7[%c0_23, %c128], %59 {strides = array<i32>} : memref<8x256xf32, #tpu.memory_space<vmem>>, vector<8x128xf32>,
    %cst_24 = arith.constant 0.000000e+00 : f32
    %61 = vector.broadcast %cst_24 : f32 to vector<8x128xf32>
    %62 = arith.maximumf %59, %61 : vector<8x128xf32>
    %63 = arith.truncf %62 : vector<8x128xf32> to vector<8x128xbf16>
    %c0_25 = arith.constant 0 : index
    %c0_26 = arith.constant 0 : index
    %64 = vector.load %arg5[%c0_25, %c0_26] : memref<128x128xbf16, #tpu.memory_space<vmem>>, vector<128x128xbf16>
    %cst_27 = arith.constant dense<0.000000e+00> : vector<8x128xf32>
    %65 = tpu.matmul %63, %64, %cst_27 {dimension_numbers = #tpu.dot_dimension_numbers<[1], [0], [0], [1], [0, 0, 1, 1], [], []>} : vector<8x128xbf16>, vector<128x128xbf16>, vector<8x128xf32> -> vector<8x128xf32>
    %c0_28 = arith.constant 0 : index
    %c0_29 = arith.constant 0 : index
    %66 = vector.load %arg6[%c0_28, %c0_29] : memref<1x128xf32, #tpu.memory_space<vmem>>, vector<1x128xf32>
    %67 = vector.broadcast %66 : vector<1x128xf32> to vector<8x128xf32>
    %68 = arith.addf %65, %67 : vector<8x128xf32>
    %cst_30 = arith.constant 5.000000e-01 : f32
    %69 = vector.broadcast %cst_30 : f32 to vector<8x128xf32>
    %70 = arith.mulf %69, %68 : vector<8x128xf32>
    %71 = math.tanh %70 : vector<8x128xf32>
    %cst_31 = arith.constant 5.000000e-01 : f32
    %72 = vector.broadcast %cst_31 : f32 to vector<8x128xf32>
    %73 = arith.mulf %72, %71 : vector<8x128xf32>
    %cst_32 = arith.constant 5.000000e-01 : f32
    %74 = vector.broadcast %cst_32 : f32 to vector<8x128xf32>
    %75 = arith.addf %73, %74 : vector<8x128xf32>
    %c0_33 = arith.constant 0 : index
    %c0_34 = arith.constant 0 : index
    %76 = vector.load %arg8[%c0_33, %c0_34] : memref<8x128xf32, #tpu.memory_space<vmem>>, vector<8x128xf32>
    tpu.vector_store %arg8[%c0_33, %c0_34], %75 {strides = array<i32>} : memref<8x128xf32, #tpu.memory_space<vmem>>, vector<8x128xf32>,
    return
  }
}

</mosaic_0001>

<bundles_post_ra>
// kernel: forward.1
= control target key start
LH: loop header
LB: loop body
LE: loop exit
PB: predicated region body
PF: predicated region fallthrough
CT: control target
= control target key end

     0   :  { %14 = vsyncpa [#allocation3], 0  ;;  %s842_s0 = inlined_call_operand.hbm [shape: f32[8,32], index: 0, kind: input, shape index: {}]   ;;  %s843_s1 = inlined_call_operand.hbm [shape: bf16[32,128], index: 1, kind: input, shape index: {}]   ;;  %s844_s2 = inlined_call_operand.hbm [shape: f32[3,128], index: 2, kind: input, shape index: {}]   ;;  %s845_s3 = inlined_call_operand.hbm [shape: bf16[128,128], index: 3, kind: input, shape index: {}]   ;;  %s846_s4 = inlined_call_operand.vmem [shape: f32[3,128], index: 4, kind: input, shape index: {}]   ;;  %s847_s5 = inlined_call_operand.hbm [shape: bf16[128,128], index: 5, kind: input, shape index: {}]   ;;  %s848_s6 = inlined_call_operand.vmem [shape: f32[1,128], index: 6, kind: input, shape index: {}]   ;;  %s849_s7 = inlined_call_operand.vmem [shape: f32[8,256], index: 7, kind: output, shape index: {0}]   ;;  %s850_s8 = inlined_call_operand.hbm [shape: f32[8,128], index: 8, kind: output, shape index: {1}]  }
   0x1   :  { %15 = vsyncpa [#allocation6], 0 }
   0x2   :  { %16 = vsyncpa [#allocation9], 0 }
   0x3   :  { %17 = vsyncpa [#allocation4], 0  ;;  %s722_s27 = smov [#allocation5]  }
   0x4   :  { %s33_s28 = sshll.u32 %s722_s27, 4  ;;  %s34_s28 = int_to_ptr.vmem [resolvable:$true] %s33_s28 }
   0x5   :  { %s602_s29 = scalar_lea.vmem %s34_s28, 256  ;;  %p607_p1 = scmp.lt.s32.totalorder %s34_s28, %s34_s28 }
   0x6   :  { %p603_p0 = scmp.ne.s32.totalorder %s34_s28, %s602_s29  ;;  %p608_p2 = scmp.lt.s32.totalorder %s602_s29, %s602_s29 }
   0x8   :  { %p609_p3 = por %p608_p2, %p607_p1 }
   0xa   :  { %p610_p4 = pnand %p609_p3, %p603_p0 }
   0xc   :  { %613 = shalt.err (!%p610_p4)
}
   0xd   :  { %s723_s30 = smov 64   ;;  %s724_s9 = smov 4  }
   0xe   :  { %39 = dma.hbm_to_vmem [thread:$0]  %s843_s1, 256, %s34_s28, [#allocation6], %s723_s30, %s723_s30, %s724_s9  }
   0xf   :  { %s725_s12 = smov [#allocation8]   ;;  %s726_s14 = smov [#allocation2]  }
  0x10   :  { %s55_s13 = sshll.u32 %s725_s12, 4  ;;  %s24_s15 = sshll.u32 %s726_s14, 4  ;;  %s56_s13 = int_to_ptr.vmem [resolvable:$true] %s55_s13  ;;  %s25_s15 = int_to_ptr.vmem [resolvable:$true] %s24_s15 }
  0x11   :  { %s622_s16 = scalar_lea.vmem %s56_s13, 1024  ;;  %p627_p6 = scmp.lt.s32.totalorder %s56_s13, %s56_s13 }
  0x12   :  { %p623_p5 = scmp.ne.s32.totalorder %s56_s13, %s622_s16  ;;  %p628_p7 = scmp.lt.s32.totalorder %s622_s16, %s622_s16 }
  0x14   :  { %p629_p8 = por %p628_p7, %p627_p6 }
  0x16   :  { %p630_p9 = pnand %p629_p8, %p623_p5 }
  0x18   :  { %633 = shalt.err (!%p630_p9)
}
  0x19   :  { %61 = dma.hbm_to_vmem [thread:$0]  %s845_s3, 1024, %s56_s13, [#allocation9], %s723_s30, %s723_s30, %s724_s9  }
  0x1a   :  { %s642_s1 = scalar_lea.vmem %s25_s15, 128  ;;  %p647_p11 = scmp.lt.s32.totalorder %s25_s15, %s25_s15 }
  0x1b   :  { %p643_p10 = scmp.ne.s32.totalorder %s25_s15, %s642_s1  ;;  %p648_p12 = scmp.lt.s32.totalorder %s642_s1, %s642_s1 }
  0x1d   :  { %p649_p13 = por %p648_p12, %p647_p11 }
  0x1f   :  { %p650_p0 = pnand %p649_p13, %p643_p10 }
  0x21   :  { %653 = shalt.err (!%p650_p0)
}
  0x22   :  { %27 = dma.hbm_to_vmem [thread:$0]  %s842_s0, 128, %s25_s15, [#allocation3]  }
  0x23   :  { %s727_s21 = smov [#allocation7]   ;;  %s728_s23 = smov [#allocation10]  }
  0x24   :  { %s46_s22 = sshll.u32 %s727_s21, 4  ;;  %s69_s24 = sshll.u32 %s728_s23, 4  ;;  %s47_s22 = int_to_ptr.vmem [resolvable:$true] %s46_s22  ;;  %s70_s24 = int_to_ptr.vmem [resolvable:$true] %s69_s24 }
  0x25   :  { %s662_s25 = scalar_lea.vmem %s47_s22, 64  ;;  %p667_p2 = scmp.lt.s32.totalorder %s47_s22, %s47_s22 }
  0x26   :  { %p663_p1 = scmp.ne.s32.totalorder %s47_s22, %s662_s25  ;;  %p668_p3 = scmp.lt.s32.totalorder %s662_s25, %s662_s25 }
  0x28   :  { %p669_p4 = por %p668_p3, %p667_p2 }
  0x2a   :  { %p670_p5 = pnand %p669_p4, %p663_p1 }
  0x2c   :  { %673 = shalt.err (!%p670_p5)
}
  0x2d   :  { %49 = dma.hbm_to_vmem [thread:$0]  %s844_s2, 64, %s47_s22, [#allocation6]  }
  0x2e   :  { %s682_s27 = scalar_lea.vmem %s70_s24, 1024  ;;  %p687_p7 = scmp.lt.s32.totalorder %s70_s24, %s70_s24 }
  0x2f   :  { %p683_p6 = scmp.ne.s32.totalorder %s70_s24, %s682_s27  ;;  %p688_p8 = scmp.lt.s32.totalorder %s682_s27, %s682_s27 }
  0x31   :  { %p689_p9 = por %p688_p8, %p687_p7 }
  0x33   :  { %p690_p10 = pnand %p689_p9, %p683_p6 }
  0x35   :  { %693 = shalt.err (!%p690_p10)
}
  0x36   :  { %75 = dma.hbm_to_vmem [thread:$0]  %s847_s5, 1024, %s70_s24, [#allocation9], %s723_s30, %s723_s30, %s724_s9  }
  0x37   :  { %714 = dma.done.wait [#allocation3], 128  }
  0x38   :  { %715 = vsyncadd [#allocation3], 4294967168 }
  0x39   :  { %716 = dma.done.wait [#allocation6], 320  }
  0x3a   :  { %717 = vsyncadd [#allocation6], 4294966976 }
  0x3b   :  { %718 = dma.done.wait [#allocation9], 2048  }
  0x3c   :  { %719 = vsyncadd [#allocation9], 4294965248  ;;  %v729_v0 = vmov 0.0   ;;  %vm730_vm0 = vmmov 0   ;;  %v570_v1 = vld [vmem:[#allocation5 + $0x8] sm:$0xff]   ;;  %v571_v2 = vld [vmem:[#allocation5] sm:$0xff]   ;;  %v101_v13 = vlaneseq }
  0x3d   :  { %512 = vmatprep.subr.bf16.mxu0 %v729_v0  ;;  %516 = vmatprep.mubr.msk.bf16.mxu0 %vm730_vm0, %v729_v0  ;;  %v94_v3 = vld [vmem:[#allocation2] sm:$0xff]  ;;  %vm117_vm1 = vcmask 261120   ;;  %v572_v5 = vld [vmem:[#allocation8 + $0x38] sm:$0xff]   ;;  %v573_v6 = vld [vmem:[#allocation8 + $0x30] sm:$0xff]   ;;  %s731_s12 = smov [#allocation11]  }
  0x3e   :  { %520 = vmatprep.subr.bf16.mxu1 %v729_v0  ;;  %536 = vmatprep.mubr.msk.bf16.mxu1 %vm730_vm0, %v729_v0  ;;  %v100_v4 = vpack.c.bf16 %v94_v3, %v94_v3  ;;  %v574_v7 = vld [vmem:[#allocation8 + $0x28] sm:$0xff]   ;;  %v575_v8 = vld [vmem:[#allocation8 + $0x20] sm:$0xff]   ;;  %v576_v9 = vld [vmem:[#allocation8 + $0x18] sm:$0xff]   ;;  %v815_v14 = vshrl.u32 %v101_v13, 7  ;;  %s458_s13 = sshll.u32 %s731_s12, 4  ;;  %s459_s13 = int_to_ptr.vmem [resolvable:$true] %s458_s13 }
  0x3f   :  { %513 = vmatpush3.bf16.msra.mxu0 %v570_v1  ;;  %521 = vmatpush3.bf16.msra.mxu1 %v572_v5  ;;  %v577_v10 = vld [vmem:[#allocation8 + $0x10] sm:$0xff]   ;;  %v578_v11 = vld [vmem:[#allocation8 + $0x8] sm:$0xff]   ;;  %v579_v12 = vld [vmem:[#allocation8] sm:$0xff]   ;;  %p699_p12 = scmp.lt.s32.totalorder %s459_s13, %s459_s13 }
  0x40   :  { %514 = vmatprep.subr.bf16.mxu0 %v729_v0  ;;  %522 = vmatprep.subr.bf16.mxu1 %v729_v0  ;;  %v103_v15 = vsub.s32 0, %v815_v14  ;;  %v99_v16 = vld [vmem:[#allocation7] sm:$0x7]  ;;  %v182_v40 = vsub.s32 1, %v815_v14  ;;  %v187_v41 = vsub.s32 2, %v815_v14  ;;  %v581_v51 = vld [vmem:[#allocation10 + $0x30] sm:$0xff]  }
  0x41   :  { %v580_v50 = vld [vmem:[#allocation10 + $0x38] sm:$0xff]   ;;  %v582_v52 = vld [vmem:[#allocation10 + $0x28] sm:$0xff]   ;;  %v583_v53 = vld [vmem:[#allocation10 + $0x20] sm:$0xff]  }
  0x42   :  { %v104_v17 = vrot.slane %v99_v16, %v103_v15  ;;  %v188_v45 = vrot.slane %v99_v16, %v187_v41  ;;  %v584_v54 = vld [vmem:[#allocation10 + $0x18] sm:$0xff]   ;;  %v585_v55 = vld [vmem:[#allocation10 + $0x10] sm:$0xff]   ;;  %v586_v56 = vld [vmem:[#allocation10 + $0x8] sm:$0xff]  }
  0x43   :  { %515 = vmatpush3.bf16.msra.mxu0 %v571_v2  ;;  %523 = vmatpush3.bf16.msra.mxu1 %v573_v6  ;;  %v587_v57 = vld [vmem:[#allocation10] sm:$0xff]  }
  0x44   :  { %540 = vmatprep.subr.bf16.mxu0 %v729_v0  ;;  %524 = vmatprep.subr.bf16.mxu1 %v729_v0  ;;  %v208_v58 = vld [vmem:[%s846_s4] sm:$0x7] }
  0x45   :  { %v213_v59 = vrot.slane %v208_v58, %v103_v15 }
  0x46   :  { %517 = vmatmul.mubr.msk.bf16.vlgmr.msra.gmra.mxu0 %vm117_vm1, %v100_v4 }
  0x47   :  { %556 = vmatprep.mubr.msk.bf16.mxu0 %vm730_vm0, %v729_v0  ;;  %525 = vmatpush3.bf16.msra.mxu1 %v574_v7 }
  0x48   :  { %526 = vmatprep.subr.bf16.mxu1 %v729_v0  ;;  %541 = vmatpush3.bf16.msra.mxu0 %v580_v50 }
  0x49   :  { %542 = vmatprep.subr.bf16.mxu0 %v729_v0 }
  0x4b   :  { %527 = vmatpush3.bf16.msra.mxu1 %v575_v8 }
  0x4c   :  { %528 = vmatprep.subr.bf16.mxu1 %v729_v0  ;;  %543 = vmatpush3.bf16.msra.mxu0 %v581_v51 }
  0x4d   :  { %544 = vmatprep.subr.bf16.mxu0 %v729_v0 }
  0x4f   :  { %529 = vmatpush3.bf16.msra.mxu1 %v576_v9 }
  0x50   :  { %530 = vmatprep.subr.bf16.mxu1 %v729_v0  ;;  %545 = vmatpush3.bf16.msra.mxu0 %v582_v52 }
  0x51   :  { %546 = vmatprep.subr.bf16.mxu0 %v729_v0 }
  0x53   :  { %531 = vmatpush3.bf16.msra.mxu1 %v577_v10 }
  0x54   :  { %532 = vmatprep.subr.bf16.mxu1 %v729_v0  ;;  %547 = vmatpush3.bf16.msra.mxu0 %v583_v53 }
  0x55   :  { %548 = vmatprep.subr.bf16.mxu0 %v729_v0 }
  0x57   :  { %533 = vmatpush3.bf16.msra.mxu1 %v578_v11 }
  0x58   :  { %534 = vmatprep.subr.bf16.mxu1 %v729_v0  ;;  %549 = vmatpush3.bf16.msra.mxu0 %v584_v54 }
  0x59   :  { %550 = vmatprep.subr.bf16.mxu0 %v729_v0 }
  0x5b   :  { %535 = vmatpush3.bf16.msra.mxu1 %v579_v12 }
  0x5c   :  { %551 = vmatpush3.bf16.msra.mxu0 %v585_v55 }
  0x5d   :  { %552 = vmatprep.subr.bf16.mxu0 %v729_v0 }
  0x60   :  { %553 = vmatpush3.bf16.msra.mxu0 %v586_v56 }
  0x61   :  { %554 = vmatprep.subr.bf16.mxu0 %v729_v0 }
  0x64   :  { %555 = vmatpush3.bf16.msra.mxu0 %v587_v57 }
 0x106   :  { %v155_v18 = vpop.f32.mrf.mxu0 }
 0x107   :  { %v156_v19 = vadd.f32 %v155_v18, %v104_v17 }
 0x108   :  { %v518_v20 = vpop.f32.mrf.mxu0 }
 0x109   :  { %v161_v21 = vrot.slane %v156_v19, 4 }
 0x10a   :  { %v158_v22 = vpop.f32.mrf.mxu0 }
 0x10b   :  { %v162_v23 = vadd.f32 %v161_v21, %v156_v19  ;;  %v329_v21 = vrot.slane %v208_v58, %v187_v41 }
 0x10c   :  { %v519_v24 = vpop.f32.mrf.mxu0 }
 0x10d   :  { %v163_v25 = vrot.slane %v162_v23, 2 }
 0x10f   :  { %v164_v26 = vadd.f32 %v163_v25, %v162_v23 }
 0x111   :  { %v165_v27 = vrot.slane %v164_v26, 1 }
 0x113   :  { %v166_v28 = vadd.f32 %v165_v27, %v164_v26  ;;  %v482_v26 = vld [vmem:[%s848_s6] ss:$0 sm:$0xff] }
 0x115   :  { %v167_v29 = vmul.f32 0.125, %v166_v28 }
 0x117   :  { %v168_v30 = vsub.f32 %v156_v19, %v167_v29 }
 0x119   :  { %v169_v31 = vmul.f32 %v168_v30, %v168_v30 }
 0x11b   :  { %v170_v32 = vrot.slane %v169_v31, 4 }
 0x11d   :  { %v171_v33 = vadd.f32 %v170_v32, %v169_v31 }
 0x11f   :  { %v172_v34 = vrot.slane %v171_v33, 2 }
 0x121   :  { %v173_v35 = vadd.f32 %v172_v34, %v171_v33 }
 0x123   :  { %v174_v36 = vrot.slane %v173_v35, 1 }
 0x125   :  { %v175_v37 = vadd.f32 %v174_v36, %v173_v35 }
 0x127   :  { %v176_v38 = vmul.f32 0.125, %v175_v37 }
 0x129   :  { %v177_v39 = vadd.f32 1e-05, %v176_v38 }
 0x12b   :  { %588 = vrsqrt.f32 %v177_v39 }
 0x138   :  { %v589_v42 = vpop.eup %588 }
 0x139   :  { %v179_v43 = vmul.f32 %v589_v42, %v99_v16 }
 0x13b   :  { %v183_v44 = vrot.slane %v179_v43, %v182_v40 }
 0x13d   :  { %v184_v46 = vmul.f32 %v183_v44, %v168_v30 }
 0x13f   :  { %v189_v47 = vadd.f32 %v188_v45, %v184_v46 }
 0x141   :  { %190 = vst [vmem:[%s849_s7] sm:$0xff] %v189_v47  ;;  %v191_v48 = vmax.f32 %v189_v47, 0.0 }
 0x143   :  { %v209_v49 = vpack.c.bf16 %v191_v48, %v191_v48 }
 0x145   :  { %537 = vmatmul.mubr.bf16.vlgmr.msra.gmra.mxu1 %v209_v49 }
 0x205   :  { %v296_v60 = vpop.f32.mrf.mxu1 }
 0x206   :  { %v297_v61 = vadd.f32 %v296_v60, %v213_v59 }
 0x207   :  { %v538_v62 = vpop.f32.mrf.mxu1 }
 0x208   :  { %v302_v63 = vrot.slane %v297_v61, 4 }
 0x209   :  { %v299_v1 = vpop.f32.mrf.mxu1 }
 0x20a   :  { %v303_v2 = vadd.f32 %v302_v63, %v297_v61 }
 0x20b   :  { %v539_v3 = vpop.f32.mrf.mxu1 }
 0x20c   :  { %v304_v4 = vrot.slane %v303_v2, 2 }
 0x20e   :  { %v305_v5 = vadd.f32 %v304_v4, %v303_v2 }
 0x210   :  { %v306_v6 = vrot.slane %v305_v5, 1 }
 0x212   :  { %v307_v7 = vadd.f32 %v306_v6, %v305_v5 }
 0x214   :  { %v308_v8 = vmul.f32 0.125, %v307_v7 }
 0x216   :  { %v309_v0 = vsub.f32 %v297_v61, %v308_v8 }
 0x218   :  { %v310_v9 = vmul.f32 %v309_v0, %v309_v0 }
 0x21a   :  { %v311_v10 = vrot.slane %v310_v9, 4 }
 0x21c   :  { %v312_v11 = vadd.f32 %v311_v10, %v310_v9 }
 0x21e   :  { %v313_v12 = vrot.slane %v312_v11, 2 }
 0x220   :  { %v314_v13 = vadd.f32 %v313_v12, %v312_v11 }
 0x222   :  { %v315_v14 = vrot.slane %v314_v13, 1 }
 0x224   :  { %v316_v15 = vadd.f32 %v315_v14, %v314_v13 }
 0x226   :  { %v317_v16 = vmul.f32 0.125, %v316_v15 }
 0x228   :  { %v318_v17 = vadd.f32 1e-05, %v317_v16 }
 0x22a   :  { %590 = vrsqrt.f32 %v318_v17 }
 0x237   :  { %v591_v18 = vpop.eup %590 }
 0x238   :  { %v320_v19 = vmul.f32 %v591_v18, %v208_v58 }
 0x23a   :  { %v324_v20 = vrot.slane %v320_v19, %v182_v40 }
 0x23c   :  { %v325_v22 = vmul.f32 %v324_v20, %v309_v0 }
 0x23e   :  { %v330_v23 = vadd.f32 %v329_v21, %v325_v22 }
 0x240   :  { %331 = vst [vmem:[%s849_s7 + $0x8] sm:$0xff] %v330_v23  ;;  %v332_v24 = vmax.f32 %v330_v23, 0.0  ;;  %s694_s7 = scalar_lea.vmem %s459_s13, 128 }
 0x241   :  { %p695_p11 = scmp.ne.s32.totalorder %s459_s13, %s694_s7  ;;  %p700_p13 = scmp.lt.s32.totalorder %s694_s7, %s694_s7 }
 0x242   :  { %v333_v25 = vpack.c.bf16 %v332_v24, %v332_v24 }
 0x243   :  { %p701_p0 = por %p700_p13, %p699_p12 }
 0x244   :  { %557 = vmatmul.mubr.bf16.vlgmr.msra.gmra.mxu0 %v333_v25 }
 0x245   :  { %p702_p1 = pnand %p701_p0, %p695_p11 }
 0x304   :  { %v439_v27 = vpop.f32.mrf.mxu0 }
 0x305   :  { %v440_v28 = vadd.f32 %v482_v26, %v439_v27 }
 0x306   :  { %v558_v29 = vpop.f32.mrf.mxu0 }
 0x307   :  { %v445_v30 = vmul.f32 0.5, %v440_v28 }
 0x308   :  { %v442_v31 = vpop.f32.mrf.mxu0 }
 0x309   :  { %592 = vtanh.f32 %v445_v30 }
 0x30a   :  { %v559_v32 = vpop.f32.mrf.mxu0 }
 0x316   :  { %v593_v33 = vpop.eup %592 }
 0x317   :  { %v447_v34 = vmul.f32 0.5, %v593_v33 }
 0x319   :  { %v448_v35 = vadd.f32 0.5, %v447_v34 }
 0x31b   :  { %449 = vst [vmem:[#allocation11] sm:$0xff] %v448_v35 }
 0x31c   :  { %705 = shalt.err (!%p702_p1)
}
 0x31d   :  { %461 = dma.vmem_to_hbm [thread:$0]  %s459_s13, 128, %s850_s8, [#allocation4]  }
 0x31e   :  { %720 = dma.done.wait [#allocation4], 128  }
 0x31f   :  { %721 = vsyncadd [#allocation4], 4294967168 }
 0x320   :  { %467 = vsyncpa [#allocation3], 1 }
 0x321   :  { %468 = vsyncpa [#allocation6], 1 }
 0x322   :  { %469 = vsyncpa [#allocation9], 1 }
 0x323   :  { %470 = vsyncpa [#allocation4], 1 }

</bundles_post_ra>
